<compile_context>
chip_gen: v7x
topology: tpu7x:2x2x1
jax: 0.10.0
libtpu: 0.0.40
codegen_flags: <defaults>
</compile_context>

<pallas_src>
import math

import jax
import jax.numpy as jnp
from jax import lax
from jax.experimental import pallas as pl
from jax.experimental.pallas import tpu as pltpu


def _build_pe(d_model: int, max_len: int = 300) -> jnp.ndarray:
    """Deterministic construction of the positional-encoding table (matches __init__)."""
    position = jnp.arange(max_len, dtype=jnp.float32)[:, None]                       # (max_len, 1)
    div_term = jnp.exp(
        jnp.arange(0, d_model, 2, dtype=jnp.float32) * (-math.log(10000.0) / d_model)
    )                                                                                 # (d_model//2,)
    pe = jnp.zeros((max_len, d_model), dtype=jnp.float32)
    pe = pe.at[:, 0::2].set(jnp.sin(position * div_term))
    pe = pe.at[:, 1::2].set(jnp.cos(position * div_term))
    return pe


def _round_up(x: int, m: int) -> int:
    return ((x + m - 1) // m) * m


def _cdiv(a: int, b: int) -> int:
    return -(-a // b)


def _onehot_gather_kernel(pos_ref, pe_ref, out_ref):
    """One grid step: gather rows*G pe rows with a single one-hot MXU matmul.

    pos_ref : (rows, G) int32 VMEM block of band-adjusted indices (pos + g*L_pad)
    pe_ref  : (G*L_pad, G*d_model) VMEM-resident block-diagonal pe table
    out_ref : (rows, G*d_model) lane-dense output block
    """
    rows, g_pack = pos_ref.shape
    depth = pe_ref.shape[0]

    # One-hot over the block-diagonal depth axis.  Bands are disjoint (each adjusted
    # index lives in [g*L_pad, g*L_pad + max_len)), so OR-ing the G band compares
    # yields a clean one-hot.  The loop is static / fully unrolled (G <= 8).
    col = lax.broadcasted_iota(jnp.int32, (rows, depth), 1)
    hit = col == pos_ref[:, 0:1]
    for g in range(1, g_pack):
        hit = jnp.logical_or(hit, col == pos_ref[:, g:g + 1])
    onehot = hit.astype(pe_ref.dtype)

    out_ref[...] = jnp.dot(
        onehot, pe_ref[...], preferred_element_type=jnp.float32
    ).astype(out_ref.dtype)


# Below this many positions a standalone Pallas launch is pure fixed cost (grid-step
# overhead + table DMA); let XLA gather directly (or fuse into the consumer).
_XLA_FAST_PATH_MAX_POSITIONS = 256


def positional_encoding_forward(pe: jnp.ndarray, pos: jnp.ndarray, *,
                                force_pallas: bool = False) -> jnp.ndarray:
    """Pallas implementation of `self.pe[pos]`."""
    max_len, d_model = pe.shape
    out_shape = tuple(pos.shape) + (d_model,)

    pos_flat = jnp.asarray(pos).reshape(-1).astype(jnp.int32)
    n = int(pos_flat.shape[0])
    if n == 0:                                            # empty-pos guard
        return jnp.zeros(out_shape, pe.dtype)

    # Match PyTorch negative-index wrap, then clamp so the in-kernel one-hot can never
    # address outside the resident table.  NOTE: out-of-range indices are silently
    # clamped instead of raising like PyTorch's pe[pos].
    pos_flat = jnp.where(pos_flat < 0, pos_flat + max_len, pos_flat)
    pos_flat = jnp.clip(pos_flat, 0, max_len - 1)

    if not force_pallas and n <= _XLA_FAST_PATH_MAX_POSITIONS:
        # TODO(synk): fuse this gather into the consumer kernel (embedding + PE add)
        # instead of a standalone launch for tiny n.
        return jnp.take(pe, pos_flat, axis=0).reshape(out_shape)

    # Lane-packing factor: gather G consecutive positions per output row so each store
    # is a full 128-lane vst.  Capped so the in-kernel one-hot stays small.
    if d_model < 128 and 128 % d_model == 0:
        g_pack = min(128 // d_model, 8)
    else:
        g_pack = 1
    l_pad = _round_up(max_len, 8)
    out_cols = g_pack * d_model

    # ---- grid sizing: >= 2 balanced steps for large n (v7x has 2 TCs), one step for
    # small n (per-step overhead dominates otherwise). -------------------------------
    packed_total = _cdiv(n, g_pack)                       # output rows needed
    min_rows, max_rows = 128, 512
    if packed_total <= 2 * min_rows:
        rows = _round_up(packed_total, 8)
        n_blocks = 1
    else:
        n_blocks = max(2, _cdiv(packed_total, max_rows))
        rows = _round_up(_cdiv(packed_total, n_blocks), 8)
        n_blocks = _cdiv(packed_total, rows)
    packed_pad = n_blocks * rows
    n_pad = packed_pad * g_pack

    if n_pad != n:
        pos_flat = jnp.pad(pos_flat, (0, n_pad - n))      # pad with index 0 (valid row)

    # Band-adjusted indices: apos[r, g] = pos[g_pack*r + g] + g*l_pad selects from the
    # block-diagonal table so one matmul emits G gathered rows side by side in lanes.
    apos = (pos_flat.reshape(packed_pad, g_pack)
            + (jnp.arange(g_pack, dtype=jnp.int32) * l_pad)[None, :])

    # Zero-padded, block-diagonal pe table (kept VMEM-resident; constant index_map).
    pe_pad = jnp.zeros((l_pad, d_model), pe.dtype).at[:max_len, :].set(pe)
    if g_pack == 1:
        pe_big = pe_pad
    else:
        pe_big = jnp.zeros((g_pack * l_pad, out_cols), pe.dtype)
        for g in range(g_pack):
            pe_big = pe_big.at[g * l_pad:(g + 1) * l_pad,
                               g * d_model:(g + 1) * d_model].set(pe_pad)

    # ---- VMEM budget: double-buffered table / pos / out blocks + in-kernel one-hot. --
    elt = jnp.dtype(pe.dtype).itemsize
    vmem_needed = (2 * pe_big.size * elt            # resident table (buffered)
                   + 2 * rows * g_pack * 4          # pos blocks
                   + 2 * rows * out_cols * elt      # output blocks
                   + rows * g_pack * l_pad * 4      # in-kernel one-hot
                   + (4 << 20))                     # margin
    # TODO(synk): tile pe along max_len instead of keeping it fully resident if
    # vmem_needed ever approaches v7x's 64 MiB per-TC VMEM.
    compiler_params = pltpu.CompilerParams(
        dimension_semantics=("parallel",),
        vmem_limit_bytes=int(vmem_needed) if vmem_needed > (32 << 20) else None,
    )

    out_packed = pl.pallas_call(
        _onehot_gather_kernel,
        out_shape=jax.ShapeDtypeStruct((packed_pad, out_cols), pe.dtype),
        grid_spec=pltpu.PrefetchScalarGridSpec(
            num_scalar_prefetch=0,
            grid=(n_blocks,),
            in_specs=[
                # Per-step VMEM block of adjusted positions (no whole-array SMEM prefetch).
                pl.BlockSpec((rows, g_pack), lambda i: (i, 0)),
                # Full block-diagonal pe table, constant block index -> DMA'd once, resident.
                pl.BlockSpec((g_pack * l_pad, out_cols), lambda i: (0, 0)),
            ],
            out_specs=pl.BlockSpec((rows, out_cols), lambda i: (i, 0)),
        ),
        compiler_params=compiler_params,
    )(apos, pe_big)

    # (packed_pad, G*d_model) row-major is exactly (n_pad, d_model) row-major: free view.
    out_flat = out_packed.reshape(n_pad, d_model)[:n]
    return out_flat.reshape(out_shape)


if __name__ == "__main__":
    d_model = 32
    max_len = 300
    batch, seq = 2, 8

    pe = _build_pe(d_model, max_len)

    key = jax.random.PRNGKey(0)
    k_small, k_large = jax.random.split(key)

    # Small case (matches module usage); force the Pallas path so the kernel runs.
    pos = jax.random.randint(k_small, (batch, seq), 0, max_len, dtype=jnp.int32)
    out = jax.block_until_ready(positional_encoding_forward(pe, pos, force_pallas=True))
    ref = pe[pos]
    assert out.shape == (batch, seq, d_model), out.shape
    assert out.dtype == pe.dtype
    assert bool(jnp.allclose(out, ref)), "small-n mismatch vs reference gather"

    # Default wrapper path for tiny n (XLA gather fast path) must also match.
    out_fast = jax.block_until_ready(positional_encoding_forward(pe, pos))
    assert bool(jnp.allclose(out_fast, ref)), "fast-path mismatch vs reference gather"

    # Larger-n case: exercises lane packing, >=2 balanced grid steps and padding.
    pos2 = jax.random.randint(k_large, (4, 300), 0, max_len, dtype=jnp.int32)
    out2 = jax.block_until_ready(positional_encoding_forward(pe, pos2))
    ref2 = pe[pos2]
    assert out2.shape == (4, 300, d_model), out2.shape
    assert bool(jnp.allclose(out2, ref2)), "large-n mismatch vs reference gather"

    print("KERNEL_OK")
</pallas_src>

<mosaic_0001>
module attributes {stable_mosaic.version = 11 : i64} {
  func.func @_onehot_gather_kernel(%arg0: i32, %arg1: memref<8x4xi32, #tpu.memory_space<vmem>>, %arg2: memref<1216x128xf32, #tpu.memory_space<vmem>>, %arg3: memref<8x128xf32, #tpu.memory_space<vmem>>) attributes {dimension_semantics = [#tpu.dimension_semantics<parallel>], iteration_bounds = array<i64: 1>, scalar_prefetch = 0 : i64, scratch_operands = 0 : i64, tpu.core_type = #tpu.core_type<tc>, window_params = [{transform_indices = @transform_0, window_bounds = array<i64: 8, 4>}, {pipeline_mode = #tpu.pipeline_mode<synchronous>, transform_indices = @transform_1, window_bounds = array<i64: 1216, 128>}, {transform_indices = @transform_2, window_bounds = array<i64: 8, 128>}]} {
    %0 = tpu.iota {dimensions = array<i32: 1>} : vector<8x1216xi32>
    %c0 = arith.constant 0 : index
    %c0_0 = arith.constant 0 : index
    %1 = vector.load %arg1[%c0, %c0_0] : memref<8x4xi32, #tpu.memory_space<vmem>>, vector<8x1xi32>
    %2 = vector.broadcast %1 : vector<8x1xi32> to vector<8x1216xi32>
    %3 = arith.cmpi eq, %0, %2 : vector<8x1216xi32>
    %c0_1 = arith.constant 0 : index
    %c1 = arith.constant 1 : index
    %4 = vector.load %arg1[%c0_1, %c1] : memref<8x4xi32, #tpu.memory_space<vmem>>, vector<8x1xi32>
    %5 = vector.broadcast %4 : vector<8x1xi32> to vector<8x1216xi32>
    %6 = arith.cmpi eq, %0, %5 : vector<8x1216xi32>
    %7 = arith.ori %3, %6 : vector<8x1216xi1>
    %c0_2 = arith.constant 0 : index
    %c2 = arith.constant 2 : index
    %8 = vector.load %arg1[%c0_2, %c2] : memref<8x4xi32, #tpu.memory_space<vmem>>, vector<8x1xi32>
    %9 = vector.broadcast %8 : vector<8x1xi32> to vector<8x1216xi32>
    %10 = arith.cmpi eq, %0, %9 : vector<8x1216xi32>
    %11 = arith.ori %7, %10 : vector<8x1216xi1>
    %c0_3 = arith.constant 0 : index
    %c3 = arith.constant 3 : index
    %12 = vector.load %arg1[%c0_3, %c3] : memref<8x4xi32, #tpu.memory_space<vmem>>, vector<8x1xi32>
    %13 = vector.broadcast %12 : vector<8x1xi32> to vector<8x1216xi32>
    %14 = arith.cmpi eq, %0, %13 : vector<8x1216xi32>
    %15 = arith.ori %11, %14 : vector<8x1216xi1>
    %16 = arith.extui %15 : vector<8x1216xi1> to vector<8x1216xi32>
    %17 = arith.sitofp %16 : vector<8x1216xi32> to vector<8x1216xf32>
    %c0_4 = arith.constant 0 : index
    %c0_5 = arith.constant 0 : index
    %18 = vector.load %arg2[%c0_4, %c0_5] : memref<1216x128xf32, #tpu.memory_space<vmem>>, vector<1216x128xf32>
    %cst = arith.constant dense<0.000000e+00> : vector<8x128xf32>
    %19 = tpu.matmul %17, %18, %cst {dimension_numbers = #tpu.dot_dimension_numbers<[1], [0], [0], [1], [0, 0, 1, 1], [], []>} : vector<8x1216xf32>, vector<1216x128xf32>, vector<8x128xf32> -> vector<8x128xf32>
    %c0_6 = arith.constant 0 : index
    %c0_7 = arith.constant 0 : index
    %20 = vector.load %arg3[%c0_6, %c0_7] : memref<8x128xf32, #tpu.memory_space<vmem>>, vector<8x128xf32>
    tpu.vector_store %arg3[%c0_6, %c0_7], %19 {strides = array<i32>} : memref<8x128xf32, #tpu.memory_space<vmem>>, vector<8x128xf32>,
    return
  }
  func.func @transform_0(%arg0: i32) -> (i32, i32) {
    %c0_i32 = arith.constant 0 : i32
    %c0_i32_0 = arith.constant 0 : i32
    return %arg0, %c0_i32 : i32, i32
  }
  func.func @transform_1(%arg0: i32) -> (i32, i32) {
    %c0_i32 = arith.constant 0 : i32
    %c0_i32_0 = arith.constant 0 : i32
    %c0_i32_1 = arith.constant 0 : i32
    return %c0_i32, %c0_i32_0 : i32, i32
  }
  func.func @transform_2(%arg0: i32) -> (i32, i32) {
    %c0_i32 = arith.constant 0 : i32
    %c0_i32_0 = arith.constant 0 : i32
    return %arg0, %c0_i32 : i32, i32
  }
}

</mosaic_0001>

<bundles_post_ra>
// kernel: tpu_custom_call.1
= control target key start
LH: loop header
LB: loop body
LE: loop exit
PB: predicated region body
PF: predicated region fallthrough
CT: control target
= control target key end

     0   :  { %7 = vsyncpa [#allocation3], 0  ;;  %s1199_s0 = inlined_call_operand.vmem [shape: s32[8,4], index: 0, kind: input, shape index: {}]   ;;  %s1200_s1 = inlined_call_operand.hbm [shape: f32[1216,128], index: 1, kind: input, shape index: {}]   ;;  %s1201_s2 = inlined_call_operand.hbm [shape: f32[8,128], index: 2, kind: output, shape index: {}]  }
   0x1   :  { %8 = vsyncpa [#allocation4], 0  ;;  %s1050_s9 = smov [#allocation2]   ;;  %s1002_s13 = scalar_lea.hbm %s1200_s1, 19456 }
   0x2   :  { %s16_s10 = sshll.u32 %s1050_s9, 4  ;;  %p1003_p0 = scmp.ne.s32.totalorder %s1200_s1, %s1002_s13  ;;  %s17_s10 = int_to_ptr.vmem [resolvable:$true] %s16_s10 }
   0x3   :  { %p1006_p1 = scmp.lt.u32.totalorder %s1002_s13, %s1200_s1 }
   0x5   :  { %p1008_p2 = pnand %p1006_p1, %p1003_p0 }
   0x7   :  { %1011 = shalt.err (!%p1008_p2)
}
   0x8   :  { %s1012_s18 = scalar_lea.vmem %s17_s10, 19456  ;;  %p1017_p4 = scmp.lt.s32.totalorder %s17_s10, %s17_s10 }
   0x9   :  { %p1013_p3 = scmp.ne.s32.totalorder %s17_s10, %s1012_s18  ;;  %p1018_p5 = scmp.lt.s32.totalorder %s1012_s18, %s1012_s18 }
   0xb   :  { %p1019_p6 = por %p1018_p5, %p1017_p4 }
   0xd   :  { %p1020_p7 = pnand %p1019_p6, %p1013_p3 }
   0xf   :  { %1023 = shalt.err (!%p1020_p7)
}
  0x10   :  { %s1051_s19 = smov 128   ;;  %s1052_s20 = smov 8  }
  0x11   :  { %22 = dma.hbm_to_vmem [thread:$0]  %s1200_s1, 19456, %s17_s10, [#allocation3], %s1051_s19, %s1051_s19, %s1052_s20  }
  0x12   :  { %1046 = dma.done.wait [#allocation3], 19456  }
  0x13   :  { %1047 = vsyncadd [#allocation3], 4294947840  ;;  %v1053_v0 = vmov 0   ;;  %v1054_v1 = vmov 2   ;;  %v37_v2 = vld [vmem:[%s1199_s0] sm:$0xff]  ;;  %v157_v4 = vld [vmem:[#allocation2 + $0x88] sm:$0xff] }
  0x14   :  { %997 = vset.pattern.permute.xlu0 %v1053_v0  ;;  %999 = vset.pattern.permute.xlu1 %v1054_v1  ;;  %v156_v3 = vld [vmem:[#allocation2 + $0x80] sm:$0xff]  ;;  %v221_v7 = vld [vmem:[#allocation2 + $0x288] sm:$0xff]  ;;  %v158_v15 = vld [vmem:[#allocation2 + $0x90] sm:$0xff]  ;;  %v1055_v22 = vmov 1   ;;  %v1056_v23 = vmov 3   ;;  %s1060_s0 = smov [#allocation5]  }
  0x15   :  { %39 = vperm.xlu0 %997, %v37_v2   ;;  %75 = vperm.xlu1 %999, %v37_v2   ;;  %v822_v5 = vpack.c.bf16 %v157_v4, %v156_v3  ;;  %v220_v6 = vld [vmem:[#allocation2 + $0x280] sm:$0xff]  ;;  %v141_v10 = vld [vmem:[#allocation2 + $0x8] sm:$0xff]  ;;  %v159_v16 = vld [vmem:[#allocation2 + $0x98] sm:$0xff]  ;;  %s653_s1 = sshll.u32 %s1060_s0, 4  ;;  %s654_s1 = int_to_ptr.vmem [resolvable:$true] %s653_s1 }
  0x16   :  { %v140_v8 = vld [vmem:[#allocation2] sm:$0xff]  ;;  %v886_v9 = vpack.c.bf16 %v221_v7, %v220_v6  ;;  %v205_v12 = vld [vmem:[#allocation2 + $0x208] sm:$0xff]  ;;  %v222_v17 = vld [vmem:[#allocation2 + $0x290] sm:$0xff]  ;;  %v826_v18 = vpack.c.bf16 %v159_v16, %v158_v15  ;;  %s1024_s25 = scalar_lea.vmem %s654_s1, 128  ;;  %p1029_p9 = scmp.lt.s32.totalorder %s654_s1, %s654_s1 }
  0x17   :  { %v204_v11 = vld [vmem:[#allocation2 + $0x200] sm:$0xff]  ;;  %823 = vmatprep.subr.bf16.mxu1 %v822_v5  ;;  %v824_v13 = vpack.c.bf16 %v141_v10, %v140_v8  ;;  %v223_v19 = vld [vmem:[#allocation2 + $0x298] sm:$0xff]  ;;  %v142_v20 = vld [vmem:[#allocation2 + $0x10] sm:$0xff]  ;;  %p1025_p8 = scmp.ne.s32.totalorder %s654_s1, %s1024_s25  ;;  %p1030_p10 = scmp.lt.s32.totalorder %s1024_s25, %s1024_s25 }
  0x18   :  { %v888_v14 = vpack.c.bf16 %v205_v12, %v204_v11  ;;  %887 = vmatprep.subr.bf16.mxu0 %v886_v9  ;;  %v143_v21 = vld [vmem:[#allocation2 + $0x18] sm:$0xff]  ;;  %v890_v24 = vpack.c.bf16 %v223_v19, %v222_v17  ;;  %v206_v25 = vld [vmem:[#allocation2 + $0x210] sm:$0xff]  ;;  %v160_v27 = vld [vmem:[#allocation2 + $0xa0] sm:$0xff] }
  0x19   :  { %998 = vset.pattern.permute.xlu0 %v1055_v22  ;;  %1000 = vset.pattern.permute.xlu1 %v1056_v23  ;;  %v207_v26 = vld [vmem:[#allocation2 + $0x218] sm:$0xff]  ;;  %v161_v28 = vld [vmem:[#allocation2 + $0xa8] sm:$0xff]  ;;  %v224_v29 = vld [vmem:[#allocation2 + $0x2a0] sm:$0xff]  ;;  %v828_v31 = vpack.c.bf16 %v143_v21, %v142_v20  ;;  %p1031_p11 = por %p1030_p10, %p1029_p9 }
  0x1a   :  { %52 = vperm.xlu0 %998, %v37_v2   ;;  %98 = vperm.xlu1 %1000, %v37_v2   ;;  %v225_v30 = vld [vmem:[#allocation2 + $0x2a8] sm:$0xff]  ;;  %v892_v32 = vpack.c.bf16 %v207_v26, %v206_v25  ;;  %v144_v33 = vld [vmem:[#allocation2 + $0x20] sm:$0xff]  ;;  %v830_v35 = vpack.c.bf16 %v161_v28, %v160_v27  ;;  %v162_v39 = vld [vmem:[#allocation2 + $0xb0] sm:$0xff] }
  0x1b   :  { %825 = vmatpush3.bf16.msra.mxu1 %v824_v13  ;;  %889 = vmatpush3.bf16.msra.mxu0 %v888_v14  ;;  %v145_v34 = vld [vmem:[#allocation2 + $0x28] sm:$0xff]  ;;  %v894_v36 = vpack.c.bf16 %v225_v30, %v224_v29  ;;  %v208_v37 = vld [vmem:[#allocation2 + $0x220] sm:$0xff]  ;;  %v163_v40 = vld [vmem:[#allocation2 + $0xb8] sm:$0xff]  ;;  %p1032_p12 = pnand %p1031_p11, %p1025_p8 }
  0x1c   :  { %827 = vmatprep.subr.bf16.mxu1 %v826_v18  ;;  %891 = vmatprep.subr.bf16.mxu0 %v890_v24  ;;  %v209_v38 = vld [vmem:[#allocation2 + $0x228] sm:$0xff]  ;;  %v226_v41 = vld [vmem:[#allocation2 + $0x2b0] sm:$0xff]  ;;  %v227_v42 = vld [vmem:[#allocation2 + $0x2b8] sm:$0xff]  ;;  %v832_v43 = vpack.c.bf16 %v145_v34, %v144_v33  ;;  %v834_v47 = vpack.c.bf16 %v163_v40, %v162_v39  ;;  %v1057_v40 = vmov 0.0|0.0  }
  0x1d   :  { %v896_v44 = vpack.c.bf16 %v209_v38, %v208_v37  ;;  %v146_v45 = vld [vmem:[#allocation2 + $0x30] sm:$0xff]  ;;  %v147_v46 = vld [vmem:[#allocation2 + $0x38] sm:$0xff]  ;;  %v898_v48 = vpack.c.bf16 %v227_v42, %v226_v41  ;;  %v164_v51 = vld [vmem:[#allocation2 + $0xc0] sm:$0xff]  ;;  %v26_v41 = vlaneseq }
  0x1e   :  { %1001 = vset.pattern.permute.xlu0 %v1056_v23  ;;  %v210_v49 = vld [vmem:[#allocation2 + $0x230] sm:$0xff]  ;;  %v211_v50 = vld [vmem:[#allocation2 + $0x238] sm:$0xff]  ;;  %v165_v52 = vld [vmem:[#allocation2 + $0xc8] sm:$0xff]  ;;  %v836_v55 = vpack.c.bf16 %v147_v46, %v146_v45 }
  0x1f   :  { %829 = vmatpush3.bf16.msra.mxu1 %v828_v31  ;;  %893 = vmatpush3.bf16.msra.mxu0 %v892_v32  ;;  %v228_v53 = vld [vmem:[#allocation2 + $0x2c0] sm:$0xff]  ;;  %v229_v54 = vld [vmem:[#allocation2 + $0x2c8] sm:$0xff]  ;;  %v900_v56 = vpack.c.bf16 %v211_v50, %v210_v49  ;;  %v838_v59 = vpack.c.bf16 %v165_v52, %v164_v51  ;;  %v166_v63 = vld [vmem:[#allocation2 + $0xd0] sm:$0xff]  ;;  %v1092_v42 = vand.u32 127, %v26_v41  ;;  %v1058_v49 = vmov 1.0  }
  0x20   :  { %831 = vmatprep.subr.bf16.mxu1 %v830_v35  ;;  %895 = vmatprep.subr.bf16.mxu0 %v894_v36  ;;  %v148_v57 = vld [vmem:[#allocation2 + $0x40] sm:$0xff]  ;;  %v149_v58 = vld [vmem:[#allocation2 + $0x48] sm:$0xff]  ;;  %v902_v60 = vpack.c.bf16 %v229_v54, %v228_v53  ;;  %v167_v0 = vld [vmem:[#allocation2 + $0xd8] sm:$0xff] }
  0x21   :  { %v212_v61 = vld [vmem:[#allocation2 + $0x240] sm:$0xff]  ;;  %v213_v62 = vld [vmem:[#allocation2 + $0x248] sm:$0xff]  ;;  %v230_v1 = vld [vmem:[#allocation2 + $0x2d0] sm:$0xff]  ;;  %v840_v3 = vpack.c.bf16 %v149_v58, %v148_v57  ;;  %v842_v7 = vpack.c.bf16 %v167_v0, %v166_v63  ;;  %v28_v45 = vadd.s32 128, %v1092_v42  ;;  %v31_v52 = vadd.s32 512, %v1092_v42 }
  0x22   :  { %v231_v2 = vld [vmem:[#allocation2 + $0x2d8] sm:$0xff]  ;;  %v904_v4 = vpack.c.bf16 %v213_v62, %v212_v61  ;;  %v150_v5 = vld [vmem:[#allocation2 + $0x50] sm:$0xff]  ;;  %v168_v11 = vld [vmem:[#allocation2 + $0xe0] sm:$0xff]  ;;  %v30_v58 = vadd.s32 384, %v1092_v42 }
  0x23   :  { %833 = vmatpush3.bf16.msra.mxu1 %v832_v43  ;;  %897 = vmatpush3.bf16.msra.mxu0 %v896_v44  ;;  %v151_v6 = vld [vmem:[#allocation2 + $0x58] sm:$0xff]  ;;  %v906_v8 = vpack.c.bf16 %v231_v2, %v230_v1  ;;  %v214_v9 = vld [vmem:[#allocation2 + $0x250] sm:$0xff]  ;;  %v169_v12 = vld [vmem:[#allocation2 + $0xe8] sm:$0xff]  ;;  %v36_v1 = vadd.s32 1152, %v1092_v42 }
  0x24   :  { %835 = vmatprep.subr.bf16.mxu1 %v834_v47  ;;  %899 = vmatprep.subr.bf16.mxu0 %v898_v48  ;;  %v215_v10 = vld [vmem:[#allocation2 + $0x258] sm:$0xff]  ;;  %v232_v13 = vld [vmem:[#allocation2 + $0x2e0] sm:$0xff]  ;;  %v233_v14 = vld [vmem:[#allocation2 + $0x2e8] sm:$0xff]  ;;  %v844_v15 = vpack.c.bf16 %v151_v6, %v150_v5  ;;  %v846_v19 = vpack.c.bf16 %v169_v12, %v168_v11  ;;  %v32_v48 = vadd.s32 640, %v1092_v42 }
  0x25   :  { %v908_v16 = vpack.c.bf16 %v215_v10, %v214_v9  ;;  %v152_v17 = vld [vmem:[#allocation2 + $0x60] sm:$0xff]  ;;  %v153_v18 = vld [vmem:[#allocation2 + $0x68] sm:$0xff]  ;;  %v910_v20 = vpack.c.bf16 %v233_v14, %v232_v13  ;;  %v170_v23 = vld [vmem:[#allocation2 + $0xf0] sm:$0xff] }
  0x26   :  { %v216_v21 = vld [vmem:[#allocation2 + $0x260] sm:$0xff]  ;;  %v217_v22 = vld [vmem:[#allocation2 + $0x268] sm:$0xff]  ;;  %v171_v24 = vld [vmem:[#allocation2 + $0xf8] sm:$0xff]  ;;  %v848_v27 = vpack.c.bf16 %v153_v18, %v152_v17 }
  0x27   :  { %837 = vmatpush3.bf16.msra.mxu1 %v836_v55  ;;  %901 = vmatpush3.bf16.msra.mxu0 %v900_v56  ;;  %v234_v25 = vld [vmem:[#allocation2 + $0x2f0] sm:$0xff]  ;;  %v235_v26 = vld [vmem:[#allocation2 + $0x2f8] sm:$0xff]  ;;  %v912_v28 = vpack.c.bf16 %v217_v22, %v216_v21  ;;  %v850_v30 = vpack.c.bf16 %v171_v24, %v170_v23  ;;  %v188_v35 = vld [vmem:[#allocation2 + $0x180] sm:$0xff] }
  0x28   :  { %839 = vmatprep.subr.bf16.mxu1 %v838_v59  ;;  %903 = vmatprep.subr.bf16.mxu0 %v902_v60  ;;  %v154_v29 = vld [vmem:[#allocation2 + $0x70] sm:$0xff]  ;;  %v914_v31 = vpack.c.bf16 %v235_v26, %v234_v25  ;;  %v155_v32 = vld [vmem:[#allocation2 + $0x78] sm:$0xff]  ;;  %v189_v36 = vld [vmem:[#allocation2 + $0x188] sm:$0xff] }
  0x29   :  { %v218_v33 = vld [vmem:[#allocation2 + $0x270] sm:$0xff]  ;;  %v219_v34 = vld [vmem:[#allocation2 + $0x278] sm:$0xff]  ;;  %v852_v37 = vpack.c.bf16 %v155_v32, %v154_v29  ;;  %v854_v39 = vpack.c.bf16 %v189_v36, %v188_v35  ;;  %v172_v50 = vld [vmem:[#allocation2 + $0x100] sm:$0xff] }
  0x2a   :  { %v916_v38 = vpack.c.bf16 %v219_v34, %v218_v33  ;;  %v173_v51 = vld [vmem:[#allocation2 + $0x108] sm:$0xff]  ;;  %v190_v53 = vld [vmem:[#allocation2 + $0x190] sm:$0xff]  ;;  %v191_v54 = vld [vmem:[#allocation2 + $0x198] sm:$0xff]  ;;  %v33_v34 = vadd.s32 768, %v1092_v42 }
  0x2b   :  { %841 = vmatpush3.bf16.msra.mxu1 %v840_v3  ;;  %905 = vmatpush3.bf16.msra.mxu0 %v904_v4  ;;  %v856_v55 = vpack.c.bf16 %v173_v51, %v172_v50  ;;  %v268_v56 = vld [vmem:[#allocation2 + $0x400] sm:$0xff]  ;;  %v269_v57 = vld [vmem:[#allocation2 + $0x408] sm:$0xff]  ;;  %v858_v59 = vpack.c.bf16 %v191_v54, %v190_v53  ;;  %v174_v60 = vld [vmem:[#allocation2 + $0x110] sm:$0xff] }
  0x2c   :  { %843 = vmatprep.subr.bf16.mxu1 %v842_v7  ;;  %907 = vmatprep.subr.bf16.mxu0 %v906_v8  ;;  %v175_v61 = vld [vmem:[#allocation2 + $0x118] sm:$0xff]  ;;  %v192_v62 = vld [vmem:[#allocation2 + $0x1a0] sm:$0xff]  ;;  %v193_v63 = vld [vmem:[#allocation2 + $0x1a8] sm:$0xff]  ;;  %v951_v0 = vpack.c.bf16 %v269_v57, %v268_v56  ;;  %v29_v57 = vadd.s32 256, %v1092_v42 }
  0x2d   :  { %v860_v2 = vpack.c.bf16 %v175_v61, %v174_v60  ;;  %v270_v3 = vld [vmem:[#allocation2 + $0x410] sm:$0xff]  ;;  %v271_v4 = vld [vmem:[#allocation2 + $0x418] sm:$0xff]  ;;  %v862_v5 = vpack.c.bf16 %v193_v63, %v192_v62  ;;  %v176_v6 = vld [vmem:[#allocation2 + $0x120] sm:$0xff] }
  0x2e   :  { %v177_v7 = vld [vmem:[#allocation2 + $0x128] sm:$0xff]  ;;  %v194_v8 = vld [vmem:[#allocation2 + $0x1b0] sm:$0xff]  ;;  %v195_v9 = vld [vmem:[#allocation2 + $0x1b8] sm:$0xff]  ;;  %v954_v10 = vpack.c.bf16 %v271_v4, %v270_v3 }
  0x2f   :  { %845 = vmatpush3.bf16.msra.mxu1 %v844_v15  ;;  %909 = vmatpush3.bf16.msra.mxu0 %v908_v16  ;;  %v864_v11 = vpack.c.bf16 %v177_v7, %v176_v6  ;;  %v272_v12 = vld [vmem:[#allocation2 + $0x420] sm:$0xff]  ;;  %v273_v13 = vld [vmem:[#allocation2 + $0x428] sm:$0xff]  ;;  %v866_v14 = vpack.c.bf16 %v195_v9, %v194_v8  ;;  %v178_v15 = vld [vmem:[#allocation2 + $0x130] sm:$0xff] }
  0x30   :  { %847 = vmatprep.subr.bf16.mxu1 %v846_v19  ;;  %911 = vmatprep.subr.bf16.mxu0 %v910_v20  ;;  %v179_v16 = vld [vmem:[#allocation2 + $0x138] sm:$0xff]  ;;  %v196_v17 = vld [vmem:[#allocation2 + $0x1c0] sm:$0xff]  ;;  %v197_v18 = vld [vmem:[#allocation2 + $0x1c8] sm:$0xff]  ;;  %v957_v19 = vpack.c.bf16 %v273_v13, %v272_v12  ;;  %v1059_v20 = vmov 0.0  }
  0x31   :  { %v868_v22 = vpack.c.bf16 %v179_v16, %v178_v15  ;;  %v274_v23 = vld [vmem:[#allocation2 + $0x430] sm:$0xff]  ;;  %v275_v24 = vld [vmem:[#allocation2 + $0x438] sm:$0xff]  ;;  %v870_v25 = vpack.c.bf16 %v197_v18, %v196_v17  ;;  %v180_v26 = vld [vmem:[#allocation2 + $0x140] sm:$0xff] }
  0x32   :  { %v199_v29 = vld [vmem:[#allocation2 + $0x1d8] sm:$0xff]  ;;  %v276_v32 = vld [vmem:[#allocation2 + $0x440] sm:$0xff]  ;;  %v277_v33 = vld [vmem:[#allocation2 + $0x448] sm:$0xff] }
  0x33   :  { %849 = vmatpush3.bf16.msra.mxu1 %v848_v27  ;;  %913 = vmatpush3.bf16.msra.mxu0 %v912_v28  ;;  %v181_v27 = vld [vmem:[#allocation2 + $0x148] sm:$0xff]  ;;  %v198_v28 = vld [vmem:[#allocation2 + $0x1d0] sm:$0xff]  ;;  %v963_v41 = vpack.c.bf16 %v277_v33, %v276_v32  ;;  %v279_v50 = vld [vmem:[#allocation2 + $0x458] sm:$0xff] }
  0x34   :  { %851 = vmatprep.subr.bf16.mxu1 %v850_v30  ;;  %915 = vmatprep.subr.bf16.mxu0 %v914_v31  ;;  %v960_v30 = vpack.c.bf16 %v275_v24, %v274_v23  ;;  %v872_v31 = vpack.c.bf16 %v181_v27, %v180_v26  ;;  %v874_v35 = vpack.c.bf16 %v199_v29, %v198_v28  ;;  %v182_v36 = vld [vmem:[#allocation2 + $0x150] sm:$0xff]  ;;  %v185_v53 = vld [vmem:[#allocation2 + $0x168] sm:$0xff]  ;;  %v280_v60 = vld [vmem:[#allocation2 + $0x460] sm:$0xff] }
  0x35   :  { %v202_v54 = vld [vmem:[#allocation2 + $0x1f0] sm:$0xff]  ;;  %v281_v61 = vld [vmem:[#allocation2 + $0x468] sm:$0xff]  ;;  %v283_v7 = vld [vmem:[#allocation2 + $0x478] sm:$0xff] }
  0x36   :  { %v186_v63 = vld [vmem:[#allocation2 + $0x170] sm:$0xff]  ;;  %v253_v3 = vld [vmem:[#allocation2 + $0x388] sm:$0xff]  ;;  %v969_v4 = vpack.c.bf16 %v281_v61, %v280_v60  ;;  %v236_v9 = vld [vmem:[#allocation2 + $0x300] sm:$0xff] }
  0x37   :  { %853 = vmatpush3.bf16.msra.mxu1 %v852_v37  ;;  %917 = vmatpush3.bf16.msra.mxu0 %v916_v38  ;;  %v183_v37 = vld [vmem:[#allocation2 + $0x158] sm:$0xff]  ;;  %v200_v38 = vld [vmem:[#allocation2 + $0x1e0] sm:$0xff]  ;;  %v282_v6 = vld [vmem:[#allocation2 + $0x470] sm:$0xff] }
  0x38   :  { %855 = vmatprep.subr.bf16.mxu1 %v854_v39  ;;  %950 = vmatprep.subr.bf16.mxu0 %v1057_v40  ;;  %v201_v39 = vld [vmem:[#allocation2 + $0x1e8] sm:$0xff]  ;;  %v255_v12 = vld [vmem:[#allocation2 + $0x398] sm:$0xff]  ;;  %v972_v13 = vpack.c.bf16 %v283_v7, %v282_v6  ;;  %v284_v15 = vld [vmem:[#allocation2 + $0x480] sm:$0xff] }
  0x39   :  { %v878_v51 = vpack.c.bf16 %v201_v39, %v200_v38  ;;  %v285_v16 = vld [vmem:[#allocation2 + $0x488] sm:$0xff]  ;;  %v238_v18 = vld [vmem:[#allocation2 + $0x310] sm:$0xff]  ;;  %v240_v27 = vld [vmem:[#allocation2 + $0x320] sm:$0xff] }
  0x3a   :  { %v286_v24 = vld [vmem:[#allocation2 + $0x490] sm:$0xff]  ;;  %v241_v28 = vld [vmem:[#allocation2 + $0x328] sm:$0xff]  ;;  %v288_v33 = vld [vmem:[#allocation2 + $0x4a0] sm:$0xff] }
  0x3b   :  { %v258_v29 = vld [vmem:[#allocation2 + $0x3b0] sm:$0xff]  ;;  %v928_v32 = vpack.c.bf16 %v241_v28, %v240_v27  ;;  %v260_v38 = vld [vmem:[#allocation2 + $0x3c0] sm:$0xff]  ;;  %v261_v39 = vld [vmem:[#allocation2 + $0x3c8] sm:$0xff] }
  0x3c   :  { %v247_v60 = vld [vmem:[#allocation2 + $0x358] sm:$0xff]  ;;  %v264_v61 = vld [vmem:[#allocation2 + $0x3e0] sm:$0xff] }
  0x94   :  { %v1094_v43 = vpop.permute.xlu0 %39  ;;  %v1096_v44 = vpop.permute.xlu1 %75 }
  0x95   :  { %vm42_vm0 = vcmp.eq.s32.totalorder %v28_v45, %v1094_v43  ;;  %vm78_vm4 = vcmp.eq.s32.totalorder %v28_v45, %v1096_v44  ;;  %vm46_vm8 = vcmp.eq.s32.totalorder %v32_v48, %v1094_v43  ;;  %vm82_vm11 = vcmp.eq.s32.totalorder %v32_v48, %v1096_v44 }
  0x96   :  { %vm41_vm15 = vcmp.eq.s32.totalorder %v1092_v42, %v1094_v43 }
  0x99   :  { %v1099_v46 = vpop.permute.xlu0 %52  ;;  %v1101_v47 = vpop.permute.xlu1 %98 }
  0x9a   :  { %vm55_vm1 = vcmp.eq.s32.totalorder %v28_v45, %v1099_v46  ;;  %vm101_vm2 = vcmp.eq.s32.totalorder %v28_v45, %v1101_v47  ;;  %vm59_vm5 = vcmp.eq.s32.totalorder %v32_v48, %v1099_v46  ;;  %vm105_vm9 = vcmp.eq.s32.totalorder %v32_v48, %v1101_v47  ;;  %v278_v48 = vld [vmem:[#allocation2 + $0x450] sm:$0xff] }
  0x9b   :  { %vm65_vm3 = vmor %vm42_vm0, %vm55_vm1  ;;  %vm54_vm12 = vcmp.eq.s32.totalorder %v1092_v42, %v1099_v46  ;;  %vm100_vm0 = vcmp.eq.s32.totalorder %v1092_v42, %v1101_v47  ;;  %v876_v45 = vpack.c.bf16 %v183_v37, %v182_v36  ;;  %v966_v56 = vpack.c.bf16 %v279_v50, %v278_v48  ;;  %v242_v36 = vld [vmem:[#allocation2 + $0x330] sm:$0xff]  ;;  %v243_v37 = vld [vmem:[#allocation2 + $0x338] sm:$0xff] }
  0x9c   :  { %vm88_vm6 = vmor %vm65_vm3, %vm78_vm4  ;;  %vm58_vm3 = vcmp.eq.s32.totalorder %v31_v52, %v1099_v46  ;;  %v932_v48 = vpack.c.bf16 %v243_v37, %v242_v36  ;;  %v290_v50 = vld [vmem:[#allocation2 + $0x4b0] sm:$0xff] }
  0x9d   :  { %vm111_vm7 = vmor %vm88_vm6, %vm101_vm2  ;;  %vm77_vm2 = vcmp.eq.s32.totalorder %v1092_v42, %v1096_v44  ;;  %vm45_vm6 = vcmp.eq.s32.totalorder %v31_v52, %v1094_v43 }
  0x9e   :  { %672 = vmatprep.mubr.msk.f32.mxu1 %vm111_vm7, %v1058_v49  ;;  %vm69_vm10 = vmor %vm46_vm8, %vm59_vm5  ;;  %vm104_vm7 = vcmp.eq.s32.totalorder %v31_v52, %v1101_v47 }
  0x9f   :  { %vm92_vm13 = vmor %vm69_vm10, %vm82_vm11  ;;  %vm57_vm10 = vcmp.eq.s32.totalorder %v30_v58, %v1099_v46 }
  0xa0   :  { %vm115_vm14 = vmor %vm92_vm13, %vm105_vm9  ;;  %vm81_vm9 = vcmp.eq.s32.totalorder %v31_v52, %v1096_v44  ;;  %vm44_vm13 = vcmp.eq.s32.totalorder %v30_v58, %v1094_v43  ;;  %v184_v52 = vld [vmem:[#allocation2 + $0x160] sm:$0xff] }
  0xa1   :  { %676 = vmatprep.mubr.msk.f32.mxu0 %vm115_vm14, %v1058_v49  ;;  %vm64_vm1 = vmor %vm41_vm15, %vm54_vm12  ;;  %vm103_vm14 = vcmp.eq.s32.totalorder %v30_v58, %v1101_v47 }
  0xa2   :  { %vm87_vm4 = vmor %vm64_vm1, %vm77_vm2  ;;  %vm63_vm1 = vcmp.eq.s32.totalorder %v36_v1, %v1099_v46 }
  0xa3   :  { %vm110_vm5 = vmor %vm87_vm4, %vm100_vm0  ;;  %vm80_vm0 = vcmp.eq.s32.totalorder %v30_v58, %v1096_v44  ;;  %vm50_vm4 = vcmp.eq.s32.totalorder %v36_v1, %v1094_v43 }
  0xa4   :  { %673 = vmatmul.mubr.msk.f32.vlgmr.msra.gmra.mrb[0].mxu1 %vm110_vm5, %v1058_v49  ;;  %vm68_vm8 = vmor %vm45_vm6, %vm58_vm3  ;;  %vm109_vm5 = vcmp.eq.s32.totalorder %v36_v1, %v1101_v47 }
  0xa5   :  { %857 = vmatpush3.bf16.msra.mxu1 %v856_v55  ;;  %vm91_vm11 = vmor %vm68_vm8, %vm81_vm9  ;;  %vm292_vm9 = vcmask 523264   ;;  %v203_v55 = vld [vmem:[#allocation2 + $0x1f8] sm:$0xff] }
  0xa6   :  { %vm114_vm12 = vmor %vm91_vm11, %vm104_vm7  ;;  %859 = vmatprep.subr.bf16.mxu1 %v858_v59  ;;  %vm86_vm7 = vcmp.eq.s32.totalorder %v36_v1, %v1096_v44  ;;  %vm60_vm11 = vcmp.eq.s32.totalorder %v33_v34, %v1099_v46  ;;  %v880_v59 = vpack.c.bf16 %v185_v53, %v184_v52  ;;  %v882_v62 = vpack.c.bf16 %v203_v55, %v202_v54  ;;  %v244_v53 = vld [vmem:[#allocation2 + $0x340] sm:$0xff]  ;;  %v245_v54 = vld [vmem:[#allocation2 + $0x348] sm:$0xff] }
  0xa7   :  { %677 = vmatmul.mubr.msk.f32.vlgmr.msra.gmra.mrb[0].mxu0 %vm114_vm12, %v1058_v49  ;;  %vm67_vm15 = vmor %vm44_vm13, %vm57_vm10  ;;  %vm47_vm12 = vcmp.eq.s32.totalorder %v33_v34, %v1094_v43  ;;  %vm106_vm13 = vcmp.eq.s32.totalorder %v33_v34, %v1101_v47  ;;  %v34_v1 = vadd.s32 896, %v1092_v42  ;;  %v934_v52 = vpack.c.bf16 %v261_v39, %v260_v38  ;;  %v262_v55 = vld [vmem:[#allocation2 + $0x3d0] sm:$0xff] }
  0xa8   :  { %952 = vmatpush1.bf16.msra.mxu0 %v951_v0  ;;  %vm90_vm2 = vmor %vm67_vm15, %vm80_vm0  ;;  %vm83_vm15 = vcmp.eq.s32.totalorder %v33_v34, %v1096_v44  ;;  %v187_v0 = vld [vmem:[#allocation2 + $0x178] sm:$0xff]  ;;  %v289_v34 = vld [vmem:[#allocation2 + $0x4a8] sm:$0xff] }
  0xa9   :  { %vm113_vm3 = vmor %vm90_vm2, %vm103_vm14  ;;  %953 = vmatprep.subr.bf16.mxu0 %v1057_v40  ;;  %861 = vmatpush3.bf16.msra.mxu1 %v860_v2  ;;  %vm56_vm2 = vcmp.eq.s32.totalorder %v29_v57, %v1099_v46  ;;  %v252_v2 = vld [vmem:[#allocation2 + $0x380] sm:$0xff] }
  0xaa   :  { %674 = vmatprep.mubr.msk.f32.mxu1 %vm113_vm3, %v1058_v49  ;;  %vm73_vm6 = vmor %vm50_vm4, %vm63_vm1  ;;  %863 = vmatprep.subr.bf16.mxu1 %v862_v5  ;;  %vm43_vm3 = vcmp.eq.s32.totalorder %v29_v57, %v1094_v43  ;;  %vm61_vm4 = vcmp.eq.s32.totalorder %v34_v1, %v1099_v46  ;;  %v884_v5 = vpack.c.bf16 %v187_v0, %v186_v63  ;;  %v249_v0 = vld [vmem:[#allocation2 + $0x368] sm:$0xff] }
  0xab   :  { %vm96_vm8 = vmor %vm73_vm6, %vm86_vm7  ;;  %v918_v8 = vpack.c.bf16 %v253_v3, %v252_v2  ;;  %vm48_vm6 = vcmp.eq.s32.totalorder %v34_v1, %v1094_v43  ;;  %vm79_vm7 = vcmp.eq.s32.totalorder %v29_v57, %v1096_v44 }
  0xac   :  { %vm119_vm10 = vmor %vm96_vm8, %vm109_vm5  ;;  %955 = vmatpush1.bf16.msra.mxu0 %v954_v10  ;;  %v237_v10 = vld [vmem:[#allocation2 + $0x308] sm:$0xff] }
  0xad   :  { %v671_v21 = vsel %vm119_vm10, 1.0, %v1059_v20  ;;  %956 = vmatprep.subr.bf16.mxu0 %v1057_v40  ;;  %865 = vmatpush3.bf16.msra.mxu1 %v864_v11  ;;  %vm70_vm14 = vmor %vm47_vm12, %vm60_vm11  ;;  %v254_v11 = vld [vmem:[#allocation2 + $0x390] sm:$0xff]  ;;  %vm102_vm10 = vcmp.eq.s32.totalorder %v29_v57, %v1101_v47  ;;  %vm84_vm11 = vcmp.eq.s32.totalorder %v34_v1, %v1096_v44  ;;  %v256_v20 = vld [vmem:[#allocation2 + $0x3a0] sm:$0xff]  ;;  %v936_v57 = vpack.c.bf16 %v245_v54, %v244_v53 }
  0xae   :  { %680 = vmatprep.mubr.msk.f32.mxu0 %vm292_vm9, %v671_v21  ;;  %867 = vmatprep.subr.bf16.mxu1 %v866_v14  ;;  %vm93_vm0 = vmor %vm70_vm14, %vm83_vm15  ;;  %v920_v14 = vpack.c.bf16 %v237_v10, %v236_v9  ;;  %v922_v17 = vpack.c.bf16 %v255_v12, %v254_v11  ;;  %v257_v21 = vld [vmem:[#allocation2 + $0x3a8] sm:$0xff] }
  0xaf   :  { %vm1156_vm1 = vmor %vm93_vm0, %vm106_vm13  ;;  %vm107_vm13 = vcmp.eq.s32.totalorder %v34_v1, %v1101_v47  ;;  %v926_v26 = vpack.c.bf16 %v257_v21, %v256_v20  ;;  %v266_v1 = vld [vmem:[#allocation2 + $0x3f0] sm:$0xff] }
  0xb0   :  { %958 = vmatpush1.bf16.msra.mxu0 %v957_v19  ;;  %vm66_vm5 = vmor %vm43_vm3, %vm56_vm2  ;;  %v239_v19 = vld [vmem:[#allocation2 + $0x318] sm:$0xff] }
  0xb1   :  { %959 = vmatprep.subr.bf16.mxu0 %v1057_v40  ;;  %869 = vmatpush3.bf16.msra.mxu1 %v868_v22  ;;  %vm71_vm8 = vmor %vm48_vm6, %vm61_vm4  ;;  %v975_v22 = vpack.c.bf16 %v285_v16, %v284_v15  ;;  %v924_v23 = vpack.c.bf16 %v239_v19, %v238_v18 }
  0xb2   :  { %871 = vmatprep.subr.bf16.mxu1 %v870_v25  ;;  %vm89_vm9 = vmor %vm66_vm5, %vm79_vm7  ;;  %v287_v25 = vld [vmem:[#allocation2 + $0x498] sm:$0xff] }
  0xb3   :  { %vm94_vm12 = vmor %vm71_vm8, %vm84_vm11 }
  0xb4   :  { %961 = vmatpush1.bf16.msra.mxu0 %v960_v30  ;;  %vm112_vm14 = vmor %vm89_vm9, %vm102_vm10  ;;  %v259_v30 = vld [vmem:[#allocation2 + $0x3b8] sm:$0xff] }
  0xb5   :  { %962 = vmatprep.subr.bf16.mxu0 %v1057_v40  ;;  %873 = vmatpush3.bf16.msra.mxu1 %v872_v31  ;;  %vm117_vm15 = vmor %vm94_vm12, %vm107_vm13  ;;  %v978_v31 = vpack.c.bf16 %v287_v25, %v286_v24 }
  0xb6   :  { %875 = vmatprep.subr.bf16.mxu1 %v874_v35  ;;  %v930_v35 = vpack.c.bf16 %v259_v30, %v258_v29 }
  0xb8   :  { %964 = vmatpush1.bf16.msra.mxu0 %v963_v41  ;;  %v35_v41 = vadd.s32 1024, %v1092_v42 }
  0xb9   :  { %965 = vmatprep.subr.bf16.mxu0 %v1057_v40  ;;  %877 = vmatpush3.bf16.msra.mxu1 %v876_v45  ;;  %v981_v45 = vpack.c.bf16 %v289_v34, %v288_v33 }
  0xba   :  { %879 = vmatprep.subr.bf16.mxu1 %v878_v51  ;;  %v291_v51 = vld [vmem:[#allocation2 + $0x4b8] sm:$0xff]  ;;  %vm62_vm0 = vcmp.eq.s32.totalorder %v35_v41, %v1099_v46  ;;  %vm49_vm2 = vcmp.eq.s32.totalorder %v35_v41, %v1094_v43  ;;  %vm85_vm4 = vcmp.eq.s32.totalorder %v35_v41, %v1096_v44  ;;  %v246_v46 = vld [vmem:[#allocation2 + $0x350] sm:$0xff]  ;;  %vm108_vm6 = vcmp.eq.s32.totalorder %v35_v41, %v1101_v47  ;;  %v265_v43 = vld [vmem:[#allocation2 + $0x3e8] sm:$0xff] }
  0xbb   :  { %v984_v42 = vpack.c.bf16 %v291_v51, %v290_v50  ;;  %vm72_vm3 = vmor %vm49_vm2, %vm62_vm0  ;;  %v942_v63 = vpack.c.bf16 %v265_v43, %v264_v61  ;;  %v267_v44 = vld [vmem:[#allocation2 + $0x3f8] sm:$0xff] }
  0xbc   :  { %967 = vmatpush1.bf16.msra.mxu0 %v966_v56  ;;  %v263_v56 = vld [vmem:[#allocation2 + $0x3d8] sm:$0xff]  ;;  %vm95_vm5 = vmor %vm72_vm3, %vm85_vm4  ;;  %v946_v3 = vpack.c.bf16 %v267_v44, %v266_v1 }
  0xbd   :  { %968 = vmatprep.subr.bf16.mxu0 %v1057_v40  ;;  %881 = vmatpush3.bf16.msra.mxu1 %v880_v59  ;;  %v938_v59 = vpack.c.bf16 %v263_v56, %v262_v55  ;;  %vm118_vm7 = vmor %vm95_vm5, %vm108_vm6  ;;  %v251_v47 = vld [vmem:[#allocation2 + $0x378] sm:$0xff] }
  0xbe   :  { %883 = vmatprep.subr.bf16.mxu1 %v882_v62  ;;  %v940_v62 = vpack.c.bf16 %v247_v60, %v246_v46 }
  0xc0   :  { %970 = vmatpush1.bf16.msra.mxu0 %v969_v4  ;;  %v250_v4 = vld [vmem:[#allocation2 + $0x370] sm:$0xff] }
  0xc1   :  { %971 = vmatprep.subr.bf16.mxu0 %v1057_v40  ;;  %885 = vmatpush3.bf16.msra.mxu1 %v884_v5  ;;  %v948_v5 = vpack.c.bf16 %v251_v47, %v250_v4 }
  0xc2   :  { %919 = vmatprep.subr.bf16.mxu1 %v918_v8 }
  0xc4   :  { %973 = vmatpush1.bf16.msra.mxu0 %v972_v13  ;;  %675 = vmatmul.mubr.msk.f32.vlgmr.msra.gmra.mrb[2].mxu1 %vm112_vm14, %v1058_v49 }
  0xc5   :  { %974 = vmatprep.subr.bf16.mxu0 %v1057_v40  ;;  %921 = vmatpush3.bf16.msra.mxu1 %v920_v14 }
  0xc6   :  { %678 = vmatprep.mubr.msk.f32.mxu1 %vm117_vm15, %v1058_v49  ;;  %923 = vmatprep.subr.bf16.mxu1 %v922_v17 }
  0xc8   :  { %976 = vmatpush1.bf16.msra.mxu0 %v975_v22 }
  0xc9   :  { %977 = vmatprep.subr.bf16.mxu0 %v1057_v40  ;;  %925 = vmatpush3.bf16.msra.mxu1 %v924_v23 }
  0xca   :  { %927 = vmatprep.subr.bf16.mxu1 %v926_v26 }
  0xcc   :  { %979 = vmatpush1.bf16.msra.mxu0 %v978_v31 }
  0xcd   :  { %980 = vmatprep.subr.bf16.mxu0 %v1057_v40  ;;  %929 = vmatpush3.bf16.msra.mxu1 %v928_v32 }
  0xce   :  { %931 = vmatprep.subr.bf16.mxu1 %v930_v35 }
  0xd0   :  { %982 = vmatpush1.bf16.msra.mxu0 %v981_v45 }
  0xd1   :  { %983 = vmatprep.subr.bf16.mxu0 %v1057_v40  ;;  %933 = vmatpush3.bf16.msra.mxu1 %v932_v48  ;;  %v248_v40 = vld [vmem:[#allocation2 + $0x360] sm:$0xff] }
  0xd2   :  { %935 = vmatprep.subr.bf16.mxu1 %v934_v52  ;;  %v944_v2 = vpack.c.bf16 %v249_v0, %v248_v40 }
  0xd4   :  { %985 = vmatpush1.bf16.msra.mxu0 %v984_v42 }
  0xd5   :  { %937 = vmatpush3.bf16.msra.mxu1 %v936_v57 }
  0xd6   :  { %939 = vmatprep.subr.bf16.mxu1 %v938_v59 }
  0xd7   :  { %681 = vmatmul.mubr.msk.f32.vlgmr.msra.gmra.mrb[2].mxu0 %vm118_vm7, %v1058_v49 }
  0xd9   :  { %941 = vmatpush3.bf16.msra.mxu1 %v940_v62 }
  0xda   :  { %943 = vmatprep.subr.bf16.mxu1 %v942_v63 }
  0xdd   :  { %945 = vmatpush3.bf16.msra.mxu1 %v944_v2 }
  0xde   :  { %947 = vmatprep.subr.bf16.mxu1 %v946_v3 }
  0xe1   :  { %949 = vmatpush3.bf16.msra.mxu1 %v948_v5 }
  0xe4   :  { %679 = vmatmul.mubr.msk.f32.vlgmr.msra.gmra.mrb[4].mxu1 %vm1156_vm1, %v1058_v49 }
 0x177   :  { %v714_v6 = vpop.f32.mrb[0].mxu1 }
 0x178   :  { %v715_v7 = vpop.f32.mrb[1].mxu1 }
 0x179   :  { %v716_v8 = vadd.f32 %v715_v7, %v714_v6 }
 0x17a   :  { %v784_v9 = vpop.f32.mrb[0].mxu0 }
 0x17b   :  { %v785_v10 = vpop.f32.mrb[1].mxu0 }
 0x17c   :  { %v786_v11 = vadd.f32 %v785_v10, %v784_v9 }
 0x197   :  { %v749_v12 = vpop.f32.mrb[2].mxu1 }
 0x198   :  { %v750_v13 = vpop.f32.mrb[3].mxu1 }
 0x199   :  { %v751_v14 = vadd.f32 %v750_v13, %v749_v12 }
 0x19b   :  { %v433_v15 = vadd.f32 %v751_v14, %v716_v8 }
 0x19d   :  { %v503_v16 = vadd.f32 %v786_v11, %v433_v15 }
 0x1aa   :  { %v642_v17 = vpop.f32.mrb[2].mxu0 }
 0x1ab   :  { %v644_v18 = vpop.f32.mrb[3].mxu0 }
 0x1b7   :  { %v819_v19 = vpop.f32.mrb[4].mxu1 }
 0x1b8   :  { %v820_v20 = vpop.f32.mrb[5].mxu1 }
 0x1b9   :  { %v821_v21 = vadd.f32 %v820_v20, %v819_v19 }
 0x1bb   :  { %v573_v58 = vadd.f32 %v821_v21, %v503_v16 }
 0x1bd   :  { %v643_v49 = vadd.f32 %v642_v17, %v573_v58 }
 0x1bf   :  { %646 = vst [vmem:[#allocation5] sm:$0xff] %v643_v49 }
 0x1c0   :  { %1035 = shalt.err (!%p1032_p12)
}
 0x1c1   :  { %s1036_s28 = scalar_lea.hbm %s1201_s2, 128 }
 0x1c2   :  { %p1037_p13 = scmp.ne.s32.totalorder %s1201_s2, %s1036_s28  ;;  %p1040_p0 = scmp.lt.u32.totalorder %s1036_s28, %s1201_s2 }
 0x1c4   :  { %p1042_p1 = pnand %p1040_p0, %p1037_p13 }
 0x1c6   :  { %1045 = shalt.err (!%p1042_p1)
}
 0x1c7   :  { %656 = dma.vmem_to_hbm [thread:$0]  %s654_s1, 128, %s1201_s2, [#allocation4]  }
 0x1c8   :  { %1048 = dma.done.wait [#allocation4], 128  }
 0x1c9   :  { %1049 = vsyncadd [#allocation4], 4294967168 }
 0x1ca   :  { %660 = vsyncpa [#allocation3], 1 }
 0x1cb   :  { %661 = vsyncpa [#allocation4], 1 }

</bundles_post_ra>
